<compile_context>
chip_gen: v5e
topology: v5e:2x2
jax: 0.10.0
libtpu: 0.0.40
codegen_flags: <defaults>
</compile_context>

<pallas_src>
import math

import jax
import jax.numpy as jnp
from jax.experimental import pallas as pl
from jax.experimental.pallas import tpu as pltpu

ACTIONS = ['UP', 'RIGHT', 'DOWN', 'LEFT', 'WAIT']
LAYER_SIZES = [4, 32, 64, 64, 64, len(ACTIONS)]  # 4->32->64->64->64->5
NUM_LAYERS = len(LAYER_SIZES) - 1

PAD = 128          # padded feature width (one lane-dense vreg column)
TILE_B_MAX = 1024  # rows per grid step at large batch


def _round_up(x, m):
    return ((x + m - 1) // m) * m


def _dqn_kernel(x_ref,
                w1_ref, b1_ref,
                w2_ref, b2_ref,
                w3_ref, b3_ref,
                w4_ref, b4_ref,
                w5_ref, b5_ref,
                out_ref):
    """One batch tile: five padded 128x128 matmuls (bf16 MXU, f32 accum) + bias + ReLU."""
    h = x_ref[...].astype(jnp.bfloat16)

    h = jnp.dot(h, w1_ref[...], preferred_element_type=jnp.float32) + b1_ref[...]
    h = jnp.maximum(h, 0.0).astype(jnp.bfloat16)

    h = jnp.dot(h, w2_ref[...], preferred_element_type=jnp.float32) + b2_ref[...]
    h = jnp.maximum(h, 0.0).astype(jnp.bfloat16)

    h = jnp.dot(h, w3_ref[...], preferred_element_type=jnp.float32) + b3_ref[...]
    h = jnp.maximum(h, 0.0).astype(jnp.bfloat16)

    h = jnp.dot(h, w4_ref[...], preferred_element_type=jnp.float32) + b4_ref[...]
    h = jnp.maximum(h, 0.0).astype(jnp.bfloat16)

    out = jnp.dot(h, w5_ref[...], preferred_element_type=jnp.float32) + b5_ref[...]
    out_ref[...] = out.astype(out_ref.dtype)


def pack_params(params):
    """One-time host-side packing: zero-pad weights to (128,128) bf16, biases to (1,128) f32."""
    packed = []
    for (w, b) in params:
        fi, fo = w.shape
        wp = jnp.zeros((PAD, PAD), jnp.float32).at[:fi, :fo].set(w).astype(jnp.bfloat16)
        bp = jnp.zeros((1, PAD), jnp.float32).at[:, :fo].set(b.reshape(1, fo))
        packed.extend([wp, bp])
    return packed


def dqn_forward(x, packed_params):
    """x: (B, 4) float32. packed_params: [W1,b1,...,W5,b5] as produced by pack_params."""
    B, f_in = x.shape
    n_out = LAYER_SIZES[-1]

    # Tile size: multiple of 128 (fills MXU rows), capped at 1024 rows (~0.5 MiB f32 per tile).
    tile_b = min(TILE_B_MAX, _round_up(max(B, 1), 128))
    b_padded = _round_up(B, tile_b)

    # Lane-dense, batch-padded input slab.
    x_pad = jnp.zeros((b_padded, PAD), jnp.float32).at[:B, :f_in].set(x)

    grid = (b_padded // tile_b,)

    x_spec = pl.BlockSpec((tile_b, PAD), lambda i: (i, 0))
    out_spec = pl.BlockSpec((tile_b, PAD), lambda i: (i, 0))
    w_spec = pl.BlockSpec((PAD, PAD), lambda i: (0, 0))   # resident: DMA'd exactly once
    b_spec = pl.BlockSpec((1, PAD), lambda i: (0, 0))     # resident: DMA'd exactly once

    out_pad = pl.pallas_call(
        _dqn_kernel,
        out_shape=jax.ShapeDtypeStruct((b_padded, PAD), jnp.float32),
        grid=grid,
        in_specs=[x_spec] + [w_spec, b_spec] * NUM_LAYERS,
        out_specs=out_spec,
        compiler_params=pltpu.CompilerParams(
            dimension_semantics=("parallel",)),
    )(x_pad, *packed_params)

    return out_pad[:B, :n_out]


def init_params(key):
    """Deterministic init mimicking torch nn.Linear default (uniform +/- 1/sqrt(fan_in))."""
    params = []
    for i in range(NUM_LAYERS):
        fan_in, fan_out = LAYER_SIZES[i], LAYER_SIZES[i + 1]
        key, kw, kb = jax.random.split(key, 3)
        bound = 1.0 / math.sqrt(fan_in)
        w = jax.random.uniform(kw, (fan_in, fan_out), jnp.float32, -bound, bound)
        b = jax.random.uniform(kb, (1, fan_out), jnp.float32, -bound, bound)
        params.append((w, b))
    return params


def dqn_reference(x, params):
    """Exact f32 reference (matches the torch module)."""
    h = x
    for (w, b) in params[:-1]:
        h = jnp.maximum(h @ w + b, 0.0)
    w, b = params[-1]
    return h @ w + b


def dqn_reference_bf16(x, params):
    """Reference that mirrors the kernel's mixed precision (bf16 matmul, f32 accum/elementwise)."""
    h = x
    for (w, b) in params[:-1]:
        h = jnp.dot(h.astype(jnp.bfloat16), w.astype(jnp.bfloat16),
                    preferred_element_type=jnp.float32) + b
        h = jnp.maximum(h, 0.0)
    w, b = params[-1]
    return jnp.dot(h.astype(jnp.bfloat16), w.astype(jnp.bfloat16),
                   preferred_element_type=jnp.float32) + b


if __name__ == "__main__":
    key = jax.random.PRNGKey(0)
    key, kx = jax.random.split(key)

    batch = 8
    x = jax.random.normal(kx, (batch, LAYER_SIZES[0]), jnp.float32)

    params = init_params(key)
    packed = pack_params(params)

    out = dqn_forward(x, packed)
    out = jax.block_until_ready(out)
    assert out.shape == (batch, len(ACTIONS)), out.shape

    # Tight check against a reference using the same bf16-matmul / f32-accum recipe.
    ref_bf16 = dqn_reference_bf16(x, params)
    assert jnp.allclose(out, ref_bf16, atol=1e-3, rtol=1e-3), "mismatch vs bf16-matched reference"

    # Loose check against the exact f32 torch-equivalent forward (only bf16 rounding differs).
    ref_f32 = dqn_reference(x, params)
    assert jnp.allclose(out, ref_f32, atol=5e-2, rtol=5e-2), "mismatch vs f32 reference"

    # Exercise the multi-tile grid path (grid > 1, TILE_B = 1024, batch padding).
    key, kx2 = jax.random.split(key)
    x_big = jax.random.normal(kx2, (1500, LAYER_SIZES[0]), jnp.float32)
    out_big = jax.block_until_ready(dqn_forward(x_big, packed))
    assert out_big.shape == (1500, len(ACTIONS)), out_big.shape
    assert jnp.allclose(out_big, dqn_reference(x_big, params), atol=5e-2, rtol=5e-2), \
        "mismatch vs f32 reference (large batch)"

    print("KERNEL_OK")
</pallas_src>

<mosaic_0001>
module attributes {stable_mosaic.version = 11 : i64} {
  func.func @_dqn_kernel(%arg0: i32, %arg1: memref<128x128xf32, #tpu.memory_space<vmem>>, %arg2: memref<128x128xbf16, #tpu.memory_space<vmem>>, %arg3: memref<1x128xf32, #tpu.memory_space<vmem>>, %arg4: memref<128x128xbf16, #tpu.memory_space<vmem>>, %arg5: memref<1x128xf32, #tpu.memory_space<vmem>>, %arg6: memref<128x128xbf16, #tpu.memory_space<vmem>>, %arg7: memref<1x128xf32, #tpu.memory_space<vmem>>, %arg8: memref<128x128xbf16, #tpu.memory_space<vmem>>, %arg9: memref<1x128xf32, #tpu.memory_space<vmem>>, %arg10: memref<128x128xbf16, #tpu.memory_space<vmem>>, %arg11: memref<1x128xf32, #tpu.memory_space<vmem>>, %arg12: memref<128x128xf32, #tpu.memory_space<vmem>>) attributes {dimension_semantics = [#tpu.dimension_semantics<parallel>], iteration_bounds = array<i64: 1>, scalar_prefetch = 0 : i64, scratch_operands = 0 : i64, tpu.core_type = #tpu.core_type<tc>, window_params = [{transform_indices = @transform_0, window_bounds = array<i64: 128, 128>}, {pipeline_mode = #tpu.pipeline_mode<synchronous>, transform_indices = @transform_1, window_bounds = array<i64: 128, 128>}, {pipeline_mode = #tpu.pipeline_mode<synchronous>, transform_indices = @transform_2, window_bounds = array<i64: 1, 128>}, {pipeline_mode = #tpu.pipeline_mode<synchronous>, transform_indices = @transform_3, window_bounds = array<i64: 128, 128>}, {pipeline_mode = #tpu.pipeline_mode<synchronous>, transform_indices = @transform_4, window_bounds = array<i64: 1, 128>}, {pipeline_mode = #tpu.pipeline_mode<synchronous>, transform_indices = @transform_5, window_bounds = array<i64: 128, 128>}, {pipeline_mode = #tpu.pipeline_mode<synchronous>, transform_indices = @transform_6, window_bounds = array<i64: 1, 128>}, {pipeline_mode = #tpu.pipeline_mode<synchronous>, transform_indices = @transform_7, window_bounds = array<i64: 128, 128>}, {pipeline_mode = #tpu.pipeline_mode<synchronous>, transform_indices = @transform_8, window_bounds = array<i64: 1, 128>}, {pipeline_mode = #tpu.pipeline_mode<synchronous>, transform_indices = @transform_9, window_bounds = array<i64: 128, 128>}, {pipeline_mode = #tpu.pipeline_mode<synchronous>, transform_indices = @transform_10, window_bounds = array<i64: 1, 128>}, {transform_indices = @transform_11, window_bounds = array<i64: 128, 128>}]} {
    %c0 = arith.constant 0 : index
    %c0_0 = arith.constant 0 : index
    %0 = vector.load %arg1[%c0, %c0_0] : memref<128x128xf32, #tpu.memory_space<vmem>>, vector<128x128xf32>
    %1 = arith.truncf %0 : vector<128x128xf32> to vector<128x128xbf16>
    %c0_1 = arith.constant 0 : index
    %c0_2 = arith.constant 0 : index
    %2 = vector.load %arg2[%c0_1, %c0_2] : memref<128x128xbf16, #tpu.memory_space<vmem>>, vector<128x128xbf16>
    %cst = arith.constant dense<0.000000e+00> : vector<128x128xf32>
    %3 = tpu.matmul %1, %2, %cst {dimension_numbers = #tpu.dot_dimension_numbers<[1], [0], [0], [1], [0, 0, 1, 1], [], []>} : vector<128x128xbf16>, vector<128x128xbf16>, vector<128x128xf32> -> vector<128x128xf32>
    %c0_3 = arith.constant 0 : index
    %c0_4 = arith.constant 0 : index
    %4 = vector.load %arg3[%c0_3, %c0_4] : memref<1x128xf32, #tpu.memory_space<vmem>>, vector<1x128xf32>
    %5 = vector.broadcast %4 : vector<1x128xf32> to vector<128x128xf32>
    %6 = arith.addf %3, %5 : vector<128x128xf32>
    %cst_5 = arith.constant 0.000000e+00 : f32
    %7 = vector.broadcast %cst_5 : f32 to vector<128x128xf32>
    %8 = arith.maximumf %6, %7 : vector<128x128xf32>
    %9 = arith.truncf %8 : vector<128x128xf32> to vector<128x128xbf16>
    %c0_6 = arith.constant 0 : index
    %c0_7 = arith.constant 0 : index
    %10 = vector.load %arg4[%c0_6, %c0_7] : memref<128x128xbf16, #tpu.memory_space<vmem>>, vector<128x128xbf16>
    %cst_8 = arith.constant dense<0.000000e+00> : vector<128x128xf32>
    %11 = tpu.matmul %9, %10, %cst_8 {dimension_numbers = #tpu.dot_dimension_numbers<[1], [0], [0], [1], [0, 0, 1, 1], [], []>} : vector<128x128xbf16>, vector<128x128xbf16>, vector<128x128xf32> -> vector<128x128xf32>
    %c0_9 = arith.constant 0 : index
    %c0_10 = arith.constant 0 : index
    %12 = vector.load %arg5[%c0_9, %c0_10] : memref<1x128xf32, #tpu.memory_space<vmem>>, vector<1x128xf32>
    %13 = vector.broadcast %12 : vector<1x128xf32> to vector<128x128xf32>
    %14 = arith.addf %11, %13 : vector<128x128xf32>
    %cst_11 = arith.constant 0.000000e+00 : f32
    %15 = vector.broadcast %cst_11 : f32 to vector<128x128xf32>
    %16 = arith.maximumf %14, %15 : vector<128x128xf32>
    %17 = arith.truncf %16 : vector<128x128xf32> to vector<128x128xbf16>
    %c0_12 = arith.constant 0 : index
    %c0_13 = arith.constant 0 : index
    %18 = vector.load %arg6[%c0_12, %c0_13] : memref<128x128xbf16, #tpu.memory_space<vmem>>, vector<128x128xbf16>
    %cst_14 = arith.constant dense<0.000000e+00> : vector<128x128xf32>
    %19 = tpu.matmul %17, %18, %cst_14 {dimension_numbers = #tpu.dot_dimension_numbers<[1], [0], [0], [1], [0, 0, 1, 1], [], []>} : vector<128x128xbf16>, vector<128x128xbf16>, vector<128x128xf32> -> vector<128x128xf32>
    %c0_15 = arith.constant 0 : index
    %c0_16 = arith.constant 0 : index
    %20 = vector.load %arg7[%c0_15, %c0_16] : memref<1x128xf32, #tpu.memory_space<vmem>>, vector<1x128xf32>
    %21 = vector.broadcast %20 : vector<1x128xf32> to vector<128x128xf32>
    %22 = arith.addf %19, %21 : vector<128x128xf32>
    %cst_17 = arith.constant 0.000000e+00 : f32
    %23 = vector.broadcast %cst_17 : f32 to vector<128x128xf32>
    %24 = arith.maximumf %22, %23 : vector<128x128xf32>
    %25 = arith.truncf %24 : vector<128x128xf32> to vector<128x128xbf16>
    %c0_18 = arith.constant 0 : index
    %c0_19 = arith.constant 0 : index
    %26 = vector.load %arg8[%c0_18, %c0_19] : memref<128x128xbf16, #tpu.memory_space<vmem>>, vector<128x128xbf16>
    %cst_20 = arith.constant dense<0.000000e+00> : vector<128x128xf32>
    %27 = tpu.matmul %25, %26, %cst_20 {dimension_numbers = #tpu.dot_dimension_numbers<[1], [0], [0], [1], [0, 0, 1, 1], [], []>} : vector<128x128xbf16>, vector<128x128xbf16>, vector<128x128xf32> -> vector<128x128xf32>
    %c0_21 = arith.constant 0 : index
    %c0_22 = arith.constant 0 : index
    %28 = vector.load %arg9[%c0_21, %c0_22] : memref<1x128xf32, #tpu.memory_space<vmem>>, vector<1x128xf32>
    %29 = vector.broadcast %28 : vector<1x128xf32> to vector<128x128xf32>
    %30 = arith.addf %27, %29 : vector<128x128xf32>
    %cst_23 = arith.constant 0.000000e+00 : f32
    %31 = vector.broadcast %cst_23 : f32 to vector<128x128xf32>
    %32 = arith.maximumf %30, %31 : vector<128x128xf32>
    %33 = arith.truncf %32 : vector<128x128xf32> to vector<128x128xbf16>
    %c0_24 = arith.constant 0 : index
    %c0_25 = arith.constant 0 : index
    %34 = vector.load %arg10[%c0_24, %c0_25] : memref<128x128xbf16, #tpu.memory_space<vmem>>, vector<128x128xbf16>
    %cst_26 = arith.constant dense<0.000000e+00> : vector<128x128xf32>
    %35 = tpu.matmul %33, %34, %cst_26 {dimension_numbers = #tpu.dot_dimension_numbers<[1], [0], [0], [1], [0, 0, 1, 1], [], []>} : vector<128x128xbf16>, vector<128x128xbf16>, vector<128x128xf32> -> vector<128x128xf32>
    %c0_27 = arith.constant 0 : index
    %c0_28 = arith.constant 0 : index
    %36 = vector.load %arg11[%c0_27, %c0_28] : memref<1x128xf32, #tpu.memory_space<vmem>>, vector<1x128xf32>
    %37 = vector.broadcast %36 : vector<1x128xf32> to vector<128x128xf32>
    %38 = arith.addf %35, %37 : vector<128x128xf32>
    %c0_29 = arith.constant 0 : index
    %c0_30 = arith.constant 0 : index
    %39 = vector.load %arg12[%c0_29, %c0_30] : memref<128x128xf32, #tpu.memory_space<vmem>>, vector<128x128xf32>
    tpu.vector_store %arg12[%c0_29, %c0_30], %38 {strides = array<i32>} : memref<128x128xf32, #tpu.memory_space<vmem>>, vector<128x128xf32>,
    return
  }
  func.func @transform_0(%arg0: i32) -> (i32, i32) {
    %c0_i32 = arith.constant 0 : i32
    %c0_i32_0 = arith.constant 0 : i32
    return %arg0, %c0_i32 : i32, i32
  }
  func.func @transform_1(%arg0: i32) -> (i32, i32) {
    %c0_i32 = arith.constant 0 : i32
    %c0_i32_0 = arith.constant 0 : i32
    %c0_i32_1 = arith.constant 0 : i32
    return %c0_i32, %c0_i32_0 : i32, i32
  }
  func.func @transform_2(%arg0: i32) -> (i32, i32) {
    %c0_i32 = arith.constant 0 : i32
    %c0_i32_0 = arith.constant 0 : i32
    %c0_i32_1 = arith.constant 0 : i32
    return %c0_i32, %c0_i32_0 : i32, i32
  }
  func.func @transform_3(%arg0: i32) -> (i32, i32) {
    %c0_i32 = arith.constant 0 : i32
    %c0_i32_0 = arith.constant 0 : i32
    %c0_i32_1 = arith.constant 0 : i32
    return %c0_i32, %c0_i32_0 : i32, i32
  }
  func.func @transform_4(%arg0: i32) -> (i32, i32) {
    %c0_i32 = arith.constant 0 : i32
    %c0_i32_0 = arith.constant 0 : i32
    %c0_i32_1 = arith.constant 0 : i32
    return %c0_i32, %c0_i32_0 : i32, i32
  }
  func.func @transform_5(%arg0: i32) -> (i32, i32) {
    %c0_i32 = arith.constant 0 : i32
    %c0_i32_0 = arith.constant 0 : i32
    %c0_i32_1 = arith.constant 0 : i32
    return %c0_i32, %c0_i32_0 : i32, i32
  }
  func.func @transform_6(%arg0: i32) -> (i32, i32) {
    %c0_i32 = arith.constant 0 : i32
    %c0_i32_0 = arith.constant 0 : i32
    %c0_i32_1 = arith.constant 0 : i32
    return %c0_i32, %c0_i32_0 : i32, i32
  }
  func.func @transform_7(%arg0: i32) -> (i32, i32) {
    %c0_i32 = arith.constant 0 : i32
    %c0_i32_0 = arith.constant 0 : i32
    %c0_i32_1 = arith.constant 0 : i32
    return %c0_i32, %c0_i32_0 : i32, i32
  }
  func.func @transform_8(%arg0: i32) -> (i32, i32) {
    %c0_i32 = arith.constant 0 : i32
    %c0_i32_0 = arith.constant 0 : i32
    %c0_i32_1 = arith.constant 0 : i32
    return %c0_i32, %c0_i32_0 : i32, i32
  }
  func.func @transform_9(%arg0: i32) -> (i32, i32) {
    %c0_i32 = arith.constant 0 : i32
    %c0_i32_0 = arith.constant 0 : i32
    %c0_i32_1 = arith.constant 0 : i32
    return %c0_i32, %c0_i32_0 : i32, i32
  }
  func.func @transform_10(%arg0: i32) -> (i32, i32) {
    %c0_i32 = arith.constant 0 : i32
    %c0_i32_0 = arith.constant 0 : i32
    %c0_i32_1 = arith.constant 0 : i32
    return %c0_i32, %c0_i32_0 : i32, i32
  }
  func.func @transform_11(%arg0: i32) -> (i32, i32) {
    %c0_i32 = arith.constant 0 : i32
    %c0_i32_0 = arith.constant 0 : i32
    return %arg0, %c0_i32 : i32, i32
  }
}

</mosaic_0001>

<bundles_post_ra>
// kernel: tpu_custom_call.1
= control target key start
LH: loop header
LB: loop body
LE: loop exit
PB: predicated region body
PF: predicated region fallthrough
CT: control target
= control target key end

     0   :  { %16 = vsyncpa [#allocation3], 0  ;;  %s1476_s0 = inlined_call_operand.hbm [shape: f32[128,128], index: 0, kind: input, shape index: {}]   ;;  %s1477_s1 = inlined_call_operand.hbm [shape: bf16[128,128], index: 1, kind: input, shape index: {}]   ;;  %s1478_s2 = inlined_call_operand.vmem [shape: f32[1,128], index: 2, kind: input, shape index: {}]   ;;  %s1479_s3 = inlined_call_operand.hbm [shape: bf16[128,128], index: 3, kind: input, shape index: {}]   ;;  %s1480_s4 = inlined_call_operand.vmem [shape: f32[1,128], index: 4, kind: input, shape index: {}]   ;;  %s1481_s5 = inlined_call_operand.hbm [shape: bf16[128,128], index: 5, kind: input, shape index: {}]   ;;  %s1482_s6 = inlined_call_operand.vmem [shape: f32[1,128], index: 6, kind: input, shape index: {}]   ;;  %s1483_s7 = inlined_call_operand.hbm [shape: bf16[128,128], index: 7, kind: input, shape index: {}]   ;;  %s1484_s8 = inlined_call_operand.vmem [shape: f32[1,128], index: 8, kind: input, shape index: {}]   ;;  %s1485_s9 = inlined_call_operand.hbm [shape: bf16[128,128], index: 9, kind: input, shape index: {}]   ;;  %s1486_s10 = inlined_call_operand.vmem [shape: f32[1,128], index: 10, kind: input, shape index: {}]   ;;  %s1487_s11 = inlined_call_operand.hbm [shape: f32[128,128], index: 11, kind: output, shape index: {}]  }
   0x1   :  { %17 = vsyncpa [#allocation6], 0 }
   0x2   :  { %18 = vsyncpa [#allocation9], 0 }
   0x3   :  { %19 = vsyncpa [#allocation12], 0  ;;  %s38_s19 = sshll.u32 %s1477_s1, 4  ;;  %s39_s19 = int_to_ptr.hbm [resolvable:$true] %s38_s19 }
   0x4   :  { %20 = vsyncpa [#allocation4], 0  ;;  %s1294_s20 = smov [#allocation5]   ;;  %s68_s24 = sshll.u32 %s1481_s5, 4  ;;  %s69_s24 = int_to_ptr.hbm [resolvable:$true] %s68_s24 }
   0x5   :  { %s40_s21 = sshll.u32 %s1294_s20, 4  ;;  %s1295_s25 = smov 64   ;;  %s41_s21 = int_to_ptr.vmem [resolvable:$true] %s40_s21 }
   0x6   :  { %s1296_s26 = smov 4   ;;  %s1297_s27 = smov [#allocation8]  }
   0x7   :  { %46 = dma.hbm_to_vmem [thread:$0]  %s39_s19, 1024, %s41_s21, [#allocation6], %s1295_s25, %s1295_s25, %s1296_s26  }
   0x8   :  { %s70_s28 = sshll.u32 %s1297_s27, 4  ;;  %s25_s30 = sshll.u32 %s1476_s0, 4  ;;  %s71_s28 = int_to_ptr.vmem [resolvable:$true] %s70_s28  ;;  %s26_s30 = int_to_ptr.hbm [resolvable:$true] %s25_s30 }
   0x9   :  { %76 = dma.hbm_to_vmem [thread:$0]  %s69_s24, 1024, %s71_s28, [#allocation9], %s1295_s25, %s1295_s25, %s1296_s26  }
   0xa   :  { %s1298_s5 = smov [#allocation2]   ;;  %s53_s15 = sshll.u32 %s1479_s3, 4  ;;  %s54_s15 = int_to_ptr.hbm [resolvable:$true] %s53_s15 }
   0xb   :  { %s27_s12 = sshll.u32 %s1298_s5, 4  ;;  %s1299_s16 = smov 128   ;;  %s28_s12 = int_to_ptr.vmem [resolvable:$true] %s27_s12 }
   0xc   :  { %s1300_s17 = smov 8   ;;  %s1301_s0 = smov [#allocation7]  }
   0xd   :  { %33 = dma.hbm_to_vmem [thread:$0]  %s26_s30, 2048, %s28_s12, [#allocation3], %s1299_s16, %s1299_s16, %s1300_s17  }
   0xe   :  { %s55_s18 = sshll.u32 %s1301_s0, 4  ;;  %s83_s21 = sshll.u32 %s1483_s7, 4  ;;  %s56_s18 = int_to_ptr.vmem [resolvable:$true] %s55_s18  ;;  %s84_s21 = int_to_ptr.hbm [resolvable:$true] %s83_s21 }
   0xf   :  { %61 = dma.hbm_to_vmem [thread:$0]  %s54_s15, 1024, %s56_s18, [#allocation6], %s1295_s25, %s1295_s25, %s1296_s26  }
  0x10   :  { %s98_s23 = sshll.u32 %s1485_s9, 4  ;;  %s1302_s24 = smov [#allocation10]   ;;  %s99_s23 = int_to_ptr.hbm [resolvable:$true] %s98_s23 }
  0x11   :  { %s85_s27 = sshll.u32 %s1302_s24, 4  ;;  %s1303_s28 = smov [#allocation11]   ;;  %s86_s27 = int_to_ptr.vmem [resolvable:$true] %s85_s27 }
  0x12   :  { %91 = dma.hbm_to_vmem [thread:$0]  %s84_s21, 1024, %s86_s27, [#allocation9], %s1295_s25, %s1295_s25, %s1296_s26  }
  0x13   :  { %s100_s7 = sshll.u32 %s1303_s28, 4  ;;  %s101_s7 = int_to_ptr.vmem [resolvable:$true] %s100_s7 }
  0x14   :  { %106 = dma.hbm_to_vmem [thread:$0]  %s99_s23, 1024, %s101_s7, [#allocation12], %s1295_s25, %s1295_s25, %s1296_s26  }
  0x15   :  { %1284 = dma.done.wait [#allocation3], 2048  }
  0x16   :  { %1285 = vsyncadd [#allocation3], 4294965248 }
  0x17   :  { %1286 = dma.done.wait [#allocation6], 2048  }
  0x18   :  { %1287 = vsyncadd [#allocation6], 4294965248 }
  0x19   :  { %1288 = dma.done.wait [#allocation9], 2048  }
  0x1a   :  { %1289 = vsyncadd [#allocation9], 4294965248 }
  0x1b   :  { %1290 = dma.done.wait [#allocation12], 1024  }
  0x1c   :  { %1291 = vsyncadd [#allocation12], 4294966272  ;;  %v1043_v0 = vld [vmem:[#allocation5 + $0x38] sm:$0xff]  ;;  %v1042_v1 = vld [vmem:[#allocation5 + $0x30] sm:$0xff]  ;;  %s860_s14 = sshll.u32 %s1487_s11, 4  ;;  %s861_s14 = int_to_ptr.hbm [resolvable:$true] %s860_s14 }
  0x1d   :  { %225 = vmatpush.bf16.msra.mxu0 %v1043_v0  ;;  %1076 = vmatpush.bf16.msra.mxu1 %v1043_v0  ;;  %v1041_v2 = vld [vmem:[#allocation5 + $0x28] sm:$0xff]  ;;  %v1040_v3 = vld [vmem:[#allocation5 + $0x20] sm:$0xff]  ;;  %v1039_v4 = vld [vmem:[#allocation5 + $0x18] sm:$0xff] }
  0x1e   :  { %1077 = vmatpush.bf16.msra.mxu2 %v1043_v0  ;;  %1078 = vmatpush.bf16.msra.mxu3 %v1043_v0  ;;  %v1038_v5 = vld [vmem:[#allocation5 + $0x10] sm:$0xff]  ;;  %v1037_v6 = vld [vmem:[#allocation5 + $0x8] sm:$0xff]  ;;  %v1036_v7 = vld [vmem:[#allocation5] sm:$0xff] }
  0x1f   :  { %v133_v8 = vld [vmem:[#allocation2] sm:$0xff]  ;;  %v134_v9 = vld [vmem:[#allocation2 + $0x8] sm:$0xff]  ;;  %v1051_v16 = vld [vmem:[#allocation7 + $0x38] sm:$0xff] }
  0x20   :  { %v137_v10 = vld [vmem:[#allocation2 + $0x20] sm:$0xff]  ;;  %v138_v11 = vld [vmem:[#allocation2 + $0x28] sm:$0xff]  ;;  %v149_v17 = vpack.c.bf16 %v134_v9, %v133_v8  ;;  %v1050_v21 = vld [vmem:[#allocation7 + $0x30] sm:$0xff] }
  0x21   :  { %226 = vmatpush.bf16.msra.mxu0 %v1042_v1  ;;  %1079 = vmatpush.bf16.msra.mxu1 %v1042_v1  ;;  %v141_v12 = vld [vmem:[#allocation2 + $0x40] sm:$0xff]  ;;  %v142_v13 = vld [vmem:[#allocation2 + $0x48] sm:$0xff]  ;;  %v151_v18 = vpack.c.bf16 %v138_v11, %v137_v10  ;;  %v135_v24 = vld [vmem:[#allocation2 + $0x10] sm:$0xff] }
  0x22   :  { %1080 = vmatpush.bf16.msra.mxu2 %v1042_v1  ;;  %1081 = vmatpush.bf16.msra.mxu3 %v1042_v1  ;;  %v145_v14 = vld [vmem:[#allocation2 + $0x60] sm:$0xff]  ;;  %v146_v15 = vld [vmem:[#allocation2 + $0x68] sm:$0xff]  ;;  %v153_v19 = vpack.c.bf16 %v142_v13, %v141_v12  ;;  %v136_v25 = vld [vmem:[#allocation2 + $0x18] sm:$0xff] }
  0x23   :  { %v155_v20 = vpack.c.bf16 %v146_v15, %v145_v14  ;;  %v1049_v22 = vld [vmem:[#allocation7 + $0x28] sm:$0xff]  ;;  %v1048_v23 = vld [vmem:[#allocation7 + $0x20] sm:$0xff]  ;;  %v139_v26 = vld [vmem:[#allocation2 + $0x30] sm:$0xff]  ;;  %v150_v33 = vpack.c.bf16 %v136_v25, %v135_v24 }
  0x24   :  { %v140_v27 = vld [vmem:[#allocation2 + $0x38] sm:$0xff]  ;;  %v143_v28 = vld [vmem:[#allocation2 + $0x50] sm:$0xff]  ;;  %v1045_v38 = vld [vmem:[#allocation7 + $0x8] sm:$0xff] }
  0x25   :  { %227 = vmatpush.bf16.msra.mxu0 %v1041_v2  ;;  %1082 = vmatpush.bf16.msra.mxu1 %v1041_v2  ;;  %v144_v29 = vld [vmem:[#allocation2 + $0x58] sm:$0xff]  ;;  %v147_v30 = vld [vmem:[#allocation2 + $0x70] sm:$0xff]  ;;  %v152_v34 = vpack.c.bf16 %v140_v27, %v139_v26  ;;  %v1044_v39 = vld [vmem:[#allocation7] sm:$0xff] }
  0x26   :  { %1083 = vmatpush.bf16.msra.mxu2 %v1041_v2  ;;  %1084 = vmatpush.bf16.msra.mxu3 %v1041_v2  ;;  %v148_v31 = vld [vmem:[#allocation2 + $0x78] sm:$0xff]  ;;  %v154_v35 = vpack.c.bf16 %v144_v29, %v143_v28  ;;  %v1046_v37 = vld [vmem:[#allocation7 + $0x10] sm:$0xff]  ;;  %v1404_v41 = vld [vmem:[%s1478_s2] ss:$0 sm:$0xff] }
  0x27   :  { %v1047_v32 = vld [vmem:[#allocation7 + $0x18] sm:$0xff]  ;;  %v156_v36 = vpack.c.bf16 %v148_v31, %v147_v30  ;;  %v1056_v24 = vld [vmem:[#allocation8 + $0x20] sm:$0xff] }
  0x28   :  { %v1059_v13 = vld [vmem:[#allocation8 + $0x38] sm:$0xff] }
  0x29   :  { %228 = vmatpush.bf16.msra.mxu0 %v1040_v3  ;;  %1085 = vmatpush.bf16.msra.mxu1 %v1040_v3  ;;  %v1055_v28 = vld [vmem:[#allocation8 + $0x18] sm:$0xff] }
  0x2a   :  { %1086 = vmatpush.bf16.msra.mxu2 %v1040_v3  ;;  %1087 = vmatpush.bf16.msra.mxu3 %v1040_v3 }
  0x2d   :  { %229 = vmatpush.bf16.msra.mxu0 %v1039_v4  ;;  %1088 = vmatpush.bf16.msra.mxu1 %v1039_v4 }
  0x2e   :  { %1089 = vmatpush.bf16.msra.mxu2 %v1039_v4  ;;  %1090 = vmatpush.bf16.msra.mxu3 %v1039_v4 }
  0x31   :  { %230 = vmatpush.bf16.msra.mxu0 %v1038_v5  ;;  %1091 = vmatpush.bf16.msra.mxu1 %v1038_v5 }
  0x32   :  { %1092 = vmatpush.bf16.msra.mxu2 %v1038_v5  ;;  %1093 = vmatpush.bf16.msra.mxu3 %v1038_v5 }
  0x35   :  { %231 = vmatpush.bf16.msra.mxu0 %v1037_v6  ;;  %1094 = vmatpush.bf16.msra.mxu1 %v1037_v6 }
  0x36   :  { %1095 = vmatpush.bf16.msra.mxu2 %v1037_v6  ;;  %1096 = vmatpush.bf16.msra.mxu3 %v1037_v6 }
  0x39   :  { %232 = vmatpush.bf16.msra.mxu0 %v1036_v7  ;;  %1097 = vmatpush.bf16.msra.mxu1 %v1036_v7 }
  0x3a   :  { %1098 = vmatpush.bf16.msra.mxu2 %v1036_v7  ;;  %1099 = vmatpush.bf16.msra.mxu3 %v1036_v7 }
  0x3c   :  { %233 = vmatmul.bf16.vlgmr.msra.gmra.mxu0 %v149_v17  ;;  %243 = vmatmul.bf16.vlgmr.msra.gmra.mxu1 %v151_v18 }
  0x3d   :  { %366 = vmatpush.bf16.msrb.mxu1 %v1051_v16  ;;  %253 = vmatmul.bf16.vlgmr.msra.gmra.mxu2 %v153_v19 }
  0x3e   :  { %263 = vmatmul.bf16.vlgmr.msra.gmra.mxu3 %v155_v20  ;;  %507 = vmatpush.bf16.msrb.mxu2 %v1059_v13 }
  0x41   :  { %367 = vmatpush.bf16.msrb.mxu1 %v1050_v21 }
  0x45   :  { %368 = vmatpush.bf16.msrb.mxu1 %v1049_v22  ;;  %v1058_v22 = vld [vmem:[#allocation8 + $0x30] sm:$0xff] }
  0x46   :  { %508 = vmatpush.bf16.msrb.mxu2 %v1058_v22  ;;  %v1066_v22 = vld [vmem:[#allocation10 + $0x30] sm:$0xff] }
  0x49   :  { %369 = vmatpush.bf16.msrb.mxu1 %v1048_v23  ;;  %v1057_v23 = vld [vmem:[#allocation8 + $0x28] sm:$0xff] }
  0x4a   :  { %509 = vmatpush.bf16.msrb.mxu2 %v1057_v23  ;;  %v1065_v23 = vld [vmem:[#allocation10 + $0x28] sm:$0xff] }
  0x4c   :  { %238 = vmatmul.bf16.gmra.mxu0 %v150_v33  ;;  %248 = vmatmul.bf16.gmra.mxu1 %v152_v34  ;;  %v1053_v33 = vld [vmem:[#allocation8 + $0x8] sm:$0xff] }
  0x4d   :  { %370 = vmatpush.bf16.msrb.mxu1 %v1047_v32  ;;  %258 = vmatmul.bf16.gmra.mxu2 %v154_v35  ;;  %v1054_v32 = vld [vmem:[#allocation8 + $0x10] sm:$0xff] }
  0x4e   :  { %268 = vmatmul.bf16.gmra.mxu3 %v156_v36  ;;  %510 = vmatpush.bf16.msrb.mxu2 %v1056_v24 }
  0x51   :  { %371 = vmatpush.bf16.msrb.mxu1 %v1046_v37  ;;  %v1052_v37 = vld [vmem:[#allocation8] sm:$0xff] }
  0x52   :  { %511 = vmatpush.bf16.msrb.mxu2 %v1055_v28 }
  0x55   :  { %372 = vmatpush.bf16.msrb.mxu1 %v1045_v38 }
  0x56   :  { %512 = vmatpush.bf16.msrb.mxu2 %v1054_v32 }
  0x59   :  { %373 = vmatpush.bf16.msrb.mxu1 %v1044_v39 }
  0x5a   :  { %513 = vmatpush.bf16.msrb.mxu2 %v1053_v33  ;;  %v1062_v33 = vld [vmem:[#allocation10 + $0x10] sm:$0xff] }
  0x5e   :  { %514 = vmatpush.bf16.msrb.mxu2 %v1052_v37 }
  0xb9   :  { %v234_v40 = vpop.f32.mrf.mxu0  ;;  %v244_v49 = vpop.f32.mrf.mxu1 }
  0xba   :  { %v235_v42 = vadd.f32 %v1404_v41, %v234_v40  ;;  %v245_v57 = vadd.f32 %v1404_v41, %v244_v49 }
  0xbc   :  { %v274_v45 = vmax.f32 %v235_v42, 0.0  ;;  %v278_v60 = vmax.f32 %v245_v57, 0.0 }
  0xc0   :  { %v254_v0 = vpop.f32.mrf.mxu2 }
  0xc1   :  { %v236_v43 = vpop.f32.mrf.mxu0  ;;  %v246_v56 = vpop.f32.mrf.mxu1  ;;  %v255_v7 = vadd.f32 %v1404_v41, %v254_v0 }
  0xc2   :  { %v237_v44 = vadd.f32 %v1404_v41, %v236_v43  ;;  %v247_v58 = vadd.f32 %v1404_v41, %v246_v56  ;;  %v264_v15 = vpop.f32.mrf.mxu3  ;;  %v1425_v43 = vld [vmem:[%s1480_s4] ss:$0 sm:$0xff] }
  0xc3   :  { %v282_v10 = vmax.f32 %v255_v7, 0.0  ;;  %v265_v25 = vadd.f32 %v1404_v41, %v264_v15 }
  0xc4   :  { %v275_v46 = vmax.f32 %v237_v44, 0.0  ;;  %v279_v61 = vmax.f32 %v247_v58, 0.0 }
  0xc5   :  { %v286_v29 = vmax.f32 %v265_v25, 0.0 }
  0xc6   :  { %v290_v47 = vpack.c.bf16 %v275_v46, %v274_v45  ;;  %v292_v62 = vpack.c.bf16 %v279_v61, %v278_v60 }
  0xc8   :  { %374 = vmatmul.bf16.vlgmr.msrb.gmra.mxu1 %v290_v47  ;;  %v256_v6 = vpop.f32.mrf.mxu2 }
  0xc9   :  { %v239_v48 = vpop.f32.mrf.mxu0  ;;  %v249_v59 = vpop.f32.mrf.mxu1  ;;  %v257_v8 = vadd.f32 %v1404_v41, %v256_v6 }
  0xca   :  { %v240_v50 = vadd.f32 %v1404_v41, %v239_v48  ;;  %v250_v1 = vadd.f32 %v1404_v41, %v249_v59  ;;  %v266_v21 = vpop.f32.mrf.mxu3 }
  0xcb   :  { %v283_v11 = vmax.f32 %v257_v8, 0.0  ;;  %v267_v26 = vadd.f32 %v1404_v41, %v266_v21 }
  0xcc   :  { %v276_v53 = vmax.f32 %v240_v50, 0.0  ;;  %v280_v3 = vmax.f32 %v250_v1, 0.0 }
  0xcd   :  { %v294_v12 = vpack.c.bf16 %v283_v11, %v282_v10  ;;  %v287_v30 = vmax.f32 %v267_v26, 0.0 }
  0xcf   :  { %v296_v31 = vpack.c.bf16 %v287_v30, %v286_v29 }
  0xd0   :  { %v259_v9 = vpop.f32.mrf.mxu2 }
  0xd1   :  { %v241_v51 = vpop.f32.mrf.mxu0  ;;  %v251_v63 = vpop.f32.mrf.mxu1  ;;  %v260_v16 = vadd.f32 %v1404_v41, %v259_v9 }
  0xd2   :  { %v242_v52 = vadd.f32 %v1404_v41, %v241_v51  ;;  %v252_v2 = vadd.f32 %v1404_v41, %v251_v63  ;;  %v269_v27 = vpop.f32.mrf.mxu3 }
  0xd3   :  { %v284_v18 = vmax.f32 %v260_v16, 0.0  ;;  %v270_v35 = vadd.f32 %v1404_v41, %v269_v27  ;;  %v1064_v27 = vld [vmem:[#allocation10 + $0x20] sm:$0xff] }
  0xd4   :  { %v277_v54 = vmax.f32 %v242_v52, 0.0  ;;  %v281_v4 = vmax.f32 %v252_v2, 0.0 }
  0xd5   :  { %v288_v38 = vmax.f32 %v270_v35, 0.0 }
  0xd6   :  { %v291_v55 = vpack.c.bf16 %v277_v54, %v276_v53  ;;  %v293_v5 = vpack.c.bf16 %v281_v4, %v280_v3 }
  0xd8   :  { %379 = vmatmul.bf16.gmra.mxu1 %v291_v55  ;;  %v261_v14 = vpop.f32.mrf.mxu2 }
  0xd9   :  { %v262_v17 = vadd.f32 %v1404_v41, %v261_v14 }
  0xda   :  { %v271_v34 = vpop.f32.mrf.mxu3 }
  0xdb   :  { %v285_v19 = vmax.f32 %v262_v17, 0.0  ;;  %v272_v36 = vadd.f32 %v1404_v41, %v271_v34  ;;  %v1061_v34 = vld [vmem:[#allocation10 + $0x8] sm:$0xff] }
  0xdd   :  { %v295_v20 = vpack.c.bf16 %v285_v19, %v284_v18  ;;  %v289_v39 = vmax.f32 %v272_v36, 0.0 }
  0xdf   :  { %v297_v40 = vpack.c.bf16 %v289_v39, %v288_v38 }
  0xe8   :  { %384 = vmatmul.bf16.gmra.mxu1 %v292_v62 }
  0xf8   :  { %389 = vmatmul.bf16.gmra.mxu1 %v293_v5 }
 0x108   :  { %394 = vmatmul.bf16.gmra.mxu1 %v294_v12 }
 0x118   :  { %399 = vmatmul.bf16.gmra.mxu1 %v295_v20  ;;  %v1067_v20 = vld [vmem:[#allocation10 + $0x38] sm:$0xff] }
 0x119   :  { %648 = vmatpush.bf16.msrb.mxu3 %v1067_v20 }
 0x11d   :  { %649 = vmatpush.bf16.msrb.mxu3 %v1066_v22 }
 0x121   :  { %650 = vmatpush.bf16.msrb.mxu3 %v1065_v23  ;;  %v1074_v23 = vld [vmem:[#allocation11 + $0x30] sm:$0xff] }
 0x125   :  { %651 = vmatpush.bf16.msrb.mxu3 %v1064_v27 }
 0x128   :  { %404 = vmatmul.bf16.gmra.mxu1 %v296_v31  ;;  %v1063_v31 = vld [vmem:[#allocation10 + $0x18] sm:$0xff] }
 0x129   :  { %652 = vmatpush.bf16.msrb.mxu3 %v1063_v31 }
 0x12d   :  { %653 = vmatpush.bf16.msrb.mxu3 %v1062_v33 }
 0x131   :  { %654 = vmatpush.bf16.msrb.mxu3 %v1061_v34  ;;  %v1070_v34 = vld [vmem:[#allocation11 + $0x10] sm:$0xff] }
 0x138   :  { %409 = vmatmul.bf16.gmra.mxu1 %v297_v40  ;;  %v1060_v40 = vld [vmem:[#allocation10] sm:$0xff] }
 0x139   :  { %655 = vmatpush.bf16.msrb.mxu3 %v1060_v40 }
 0x145   :  { %v375_v42 = vpop.f32.mrf.mxu1 }
 0x146   :  { %v376_v44 = vadd.f32 %v1425_v43, %v375_v42 }
 0x148   :  { %v415_v47 = vmax.f32 %v376_v44, 0.0 }
 0x14d   :  { %v377_v45 = vpop.f32.mrf.mxu1 }
 0x14e   :  { %v378_v46 = vadd.f32 %v1425_v43, %v377_v45  ;;  %v1446_v45 = vld [vmem:[%s1482_s6] ss:$0 sm:$0xff] }
 0x150   :  { %v416_v48 = vmax.f32 %v378_v46, 0.0 }
 0x152   :  { %v431_v41 = vpack.c.bf16 %v416_v48, %v415_v47 }
 0x154   :  { %515 = vmatmul.bf16.vlgmr.msrb.gmra.mxu2 %v431_v41 }
 0x155   :  { %v380_v49 = vpop.f32.mrf.mxu1 }
 0x156   :  { %v381_v50 = vadd.f32 %v1425_v43, %v380_v49 }
 0x158   :  { %v417_v53 = vmax.f32 %v381_v50, 0.0 }
 0x15d   :  { %v382_v51 = vpop.f32.mrf.mxu1 }
 0x15e   :  { %v383_v52 = vadd.f32 %v1425_v43, %v382_v51 }
 0x160   :  { %v418_v54 = vmax.f32 %v383_v52, 0.0 }
 0x162   :  { %v432_v55 = vpack.c.bf16 %v418_v54, %v417_v53 }
 0x164   :  { %520 = vmatmul.bf16.gmra.mxu2 %v432_v55 }
 0x165   :  { %v385_v56 = vpop.f32.mrf.mxu1 }
 0x166   :  { %v386_v57 = vadd.f32 %v1425_v43, %v385_v56 }
 0x168   :  { %v419_v60 = vmax.f32 %v386_v57, 0.0 }
 0x16d   :  { %v387_v58 = vpop.f32.mrf.mxu1 }
 0x16e   :  { %v388_v59 = vadd.f32 %v1425_v43, %v387_v58 }
 0x170   :  { %v420_v61 = vmax.f32 %v388_v59, 0.0 }
 0x172   :  { %v433_v62 = vpack.c.bf16 %v420_v61, %v419_v60 }
 0x174   :  { %525 = vmatmul.bf16.gmra.mxu2 %v433_v62 }
 0x175   :  { %v390_v63 = vpop.f32.mrf.mxu1 }
 0x176   :  { %v391_v0 = vadd.f32 %v1425_v43, %v390_v63 }
 0x178   :  { %v421_v3 = vmax.f32 %v391_v0, 0.0 }
 0x17d   :  { %v392_v1 = vpop.f32.mrf.mxu1 }
 0x17e   :  { %v393_v2 = vadd.f32 %v1425_v43, %v392_v1 }
 0x180   :  { %v422_v4 = vmax.f32 %v393_v2, 0.0 }
 0x182   :  { %v434_v5 = vpack.c.bf16 %v422_v4, %v421_v3 }
 0x184   :  { %530 = vmatmul.bf16.gmra.mxu2 %v434_v5 }
 0x185   :  { %v395_v6 = vpop.f32.mrf.mxu1 }
 0x186   :  { %v396_v7 = vadd.f32 %v1425_v43, %v395_v6 }
 0x188   :  { %v423_v10 = vmax.f32 %v396_v7, 0.0 }
 0x18d   :  { %v397_v8 = vpop.f32.mrf.mxu1 }
 0x18e   :  { %v398_v9 = vadd.f32 %v1425_v43, %v397_v8 }
 0x190   :  { %v424_v11 = vmax.f32 %v398_v9, 0.0 }
 0x192   :  { %v435_v12 = vpack.c.bf16 %v424_v11, %v423_v10 }
 0x194   :  { %535 = vmatmul.bf16.gmra.mxu2 %v435_v12 }
 0x195   :  { %v400_v13 = vpop.f32.mrf.mxu1 }
 0x196   :  { %v401_v14 = vadd.f32 %v1425_v43, %v400_v13 }
 0x198   :  { %v425_v17 = vmax.f32 %v401_v14, 0.0 }
 0x19d   :  { %v402_v15 = vpop.f32.mrf.mxu1 }
 0x19e   :  { %v403_v16 = vadd.f32 %v1425_v43, %v402_v15 }
 0x1a0   :  { %v426_v18 = vmax.f32 %v403_v16, 0.0 }
 0x1a2   :  { %v436_v19 = vpack.c.bf16 %v426_v18, %v425_v17 }
 0x1a4   :  { %540 = vmatmul.bf16.gmra.mxu2 %v436_v19 }
 0x1a5   :  { %v405_v21 = vpop.f32.mrf.mxu1 }
 0x1a6   :  { %v406_v24 = vadd.f32 %v1425_v43, %v405_v21  ;;  %v1075_v21 = vld [vmem:[#allocation11 + $0x38] sm:$0xff] }
 0x1a7   :  { %789 = vmatpush.bf16.msrb.mxu0 %v1075_v21 }
 0x1a8   :  { %v427_v28 = vmax.f32 %v406_v24, 0.0  ;;  %v1073_v24 = vld [vmem:[#allocation11 + $0x28] sm:$0xff] }
 0x1ab   :  { %790 = vmatpush.bf16.msrb.mxu0 %v1074_v23 }
 0x1ad   :  { %v407_v25 = vpop.f32.mrf.mxu1 }
 0x1ae   :  { %v408_v26 = vadd.f32 %v1425_v43, %v407_v25 }
 0x1af   :  { %791 = vmatpush.bf16.msrb.mxu0 %v1073_v24 }
 0x1b0   :  { %v428_v29 = vmax.f32 %v408_v26, 0.0 }
 0x1b2   :  { %v437_v30 = vpack.c.bf16 %v428_v29, %v427_v28  ;;  %v1072_v28 = vld [vmem:[#allocation11 + $0x20] sm:$0xff] }
 0x1b3   :  { %792 = vmatpush.bf16.msrb.mxu0 %v1072_v28 }
 0x1b4   :  { %545 = vmatmul.bf16.gmra.mxu2 %v437_v30 }
 0x1b5   :  { %v410_v32 = vpop.f32.mrf.mxu1 }
 0x1b6   :  { %v411_v35 = vadd.f32 %v1425_v43, %v410_v32  ;;  %v1071_v32 = vld [vmem:[#allocation11 + $0x18] sm:$0xff] }
 0x1b7   :  { %793 = vmatpush.bf16.msrb.mxu0 %v1071_v32 }
 0x1b8   :  { %v429_v38 = vmax.f32 %v411_v35, 0.0  ;;  %v1069_v35 = vld [vmem:[#allocation11 + $0x8] sm:$0xff] }
 0x1bb   :  { %794 = vmatpush.bf16.msrb.mxu0 %v1070_v34 }
 0x1bd   :  { %v412_v36 = vpop.f32.mrf.mxu1 }
 0x1be   :  { %v413_v37 = vadd.f32 %v1425_v43, %v412_v36 }
 0x1bf   :  { %795 = vmatpush.bf16.msrb.mxu0 %v1069_v35 }
 0x1c0   :  { %v430_v39 = vmax.f32 %v413_v37, 0.0 }
 0x1c2   :  { %v438_v42 = vpack.c.bf16 %v430_v39, %v429_v38 }
 0x1c4   :  { %550 = vmatmul.bf16.gmra.mxu2 %v438_v42  ;;  %v1068_v42 = vld [vmem:[#allocation11] sm:$0xff] }
 0x1c5   :  { %796 = vmatpush.bf16.msrb.mxu0 %v1068_v42 }
 0x1d7   :  { %v516_v44 = vpop.f32.mrf.mxu2 }
 0x1d8   :  { %v517_v46 = vadd.f32 %v1446_v45, %v516_v44 }
 0x1da   :  { %v556_v41 = vmax.f32 %v517_v46, 0.0 }
 0x1df   :  { %v518_v47 = vpop.f32.mrf.mxu2 }
 0x1e0   :  { %v519_v48 = vadd.f32 %v1446_v45, %v518_v47  ;;  %v1114_v47 = vld [vmem:[%s1484_s8] ss:$0 sm:$0xff] }
 0x1e2   :  { %v557_v43 = vmax.f32 %v519_v48, 0.0 }
 0x1e4   :  { %v572_v49 = vpack.c.bf16 %v557_v43, %v556_v41 }
 0x1e6   :  { %656 = vmatmul.bf16.vlgmr.msrb.gmra.mxu3 %v572_v49 }
 0x1e7   :  { %v521_v50 = vpop.f32.mrf.mxu2 }
 0x1e8   :  { %v522_v51 = vadd.f32 %v1446_v45, %v521_v50 }
 0x1ea   :  { %v558_v54 = vmax.f32 %v522_v51, 0.0 }
 0x1ef   :  { %v523_v52 = vpop.f32.mrf.mxu2 }
 0x1f0   :  { %v524_v53 = vadd.f32 %v1446_v45, %v523_v52 }
 0x1f2   :  { %v559_v55 = vmax.f32 %v524_v53, 0.0 }
 0x1f4   :  { %v573_v56 = vpack.c.bf16 %v559_v55, %v558_v54 }
 0x1f6   :  { %661 = vmatmul.bf16.gmra.mxu3 %v573_v56 }
 0x1f7   :  { %v526_v57 = vpop.f32.mrf.mxu2 }
 0x1f8   :  { %v527_v58 = vadd.f32 %v1446_v45, %v526_v57 }
 0x1fa   :  { %v560_v61 = vmax.f32 %v527_v58, 0.0 }
 0x1ff   :  { %v528_v59 = vpop.f32.mrf.mxu2 }
 0x200   :  { %v529_v60 = vadd.f32 %v1446_v45, %v528_v59 }
 0x202   :  { %v561_v62 = vmax.f32 %v529_v60, 0.0 }
 0x204   :  { %v574_v63 = vpack.c.bf16 %v561_v62, %v560_v61 }
 0x206   :  { %666 = vmatmul.bf16.gmra.mxu3 %v574_v63 }
 0x207   :  { %v531_v0 = vpop.f32.mrf.mxu2 }
 0x208   :  { %v532_v1 = vadd.f32 %v1446_v45, %v531_v0 }
 0x20a   :  { %v562_v4 = vmax.f32 %v532_v1, 0.0 }
 0x20f   :  { %v533_v2 = vpop.f32.mrf.mxu2 }
 0x210   :  { %v534_v3 = vadd.f32 %v1446_v45, %v533_v2 }
 0x212   :  { %v563_v5 = vmax.f32 %v534_v3, 0.0 }
 0x214   :  { %v575_v6 = vpack.c.bf16 %v563_v5, %v562_v4 }
 0x216   :  { %671 = vmatmul.bf16.gmra.mxu3 %v575_v6 }
 0x217   :  { %v536_v7 = vpop.f32.mrf.mxu2 }
 0x218   :  { %v537_v8 = vadd.f32 %v1446_v45, %v536_v7 }
 0x21a   :  { %v564_v11 = vmax.f32 %v537_v8, 0.0 }
 0x21f   :  { %v538_v9 = vpop.f32.mrf.mxu2 }
 0x220   :  { %v539_v10 = vadd.f32 %v1446_v45, %v538_v9 }
 0x222   :  { %v565_v12 = vmax.f32 %v539_v10, 0.0 }
 0x224   :  { %v576_v13 = vpack.c.bf16 %v565_v12, %v564_v11 }
 0x226   :  { %676 = vmatmul.bf16.gmra.mxu3 %v576_v13 }
 0x227   :  { %v541_v14 = vpop.f32.mrf.mxu2 }
 0x228   :  { %v542_v15 = vadd.f32 %v1446_v45, %v541_v14 }
 0x22a   :  { %v566_v18 = vmax.f32 %v542_v15, 0.0 }
 0x22f   :  { %v543_v16 = vpop.f32.mrf.mxu2 }
 0x230   :  { %v544_v17 = vadd.f32 %v1446_v45, %v543_v16 }
 0x232   :  { %v567_v19 = vmax.f32 %v544_v17, 0.0 }
 0x234   :  { %v577_v20 = vpack.c.bf16 %v567_v19, %v566_v18 }
 0x236   :  { %681 = vmatmul.bf16.gmra.mxu3 %v577_v20 }
 0x237   :  { %v546_v22 = vpop.f32.mrf.mxu2 }
 0x238   :  { %v547_v25 = vadd.f32 %v1446_v45, %v546_v22 }
 0x23a   :  { %v568_v29 = vmax.f32 %v547_v25, 0.0 }
 0x23f   :  { %v548_v26 = vpop.f32.mrf.mxu2 }
 0x240   :  { %v549_v27 = vadd.f32 %v1446_v45, %v548_v26 }
 0x242   :  { %v569_v30 = vmax.f32 %v549_v27, 0.0 }
 0x244   :  { %v578_v31 = vpack.c.bf16 %v569_v30, %v568_v29 }
 0x246   :  { %686 = vmatmul.bf16.gmra.mxu3 %v578_v31 }
 0x247   :  { %v551_v33 = vpop.f32.mrf.mxu2 }
 0x248   :  { %v552_v36 = vadd.f32 %v1446_v45, %v551_v33 }
 0x24a   :  { %v570_v39 = vmax.f32 %v552_v36, 0.0  ;;  %v1115_v36 = vld [vmem:[%s1486_s10] ss:$0 sm:$0xff]  ;;  %s1304_s10 = smov [#allocation13]  }
 0x24b   :  { %s858_s5 = sshll.u32 %s1304_s10, 4  ;;  %s859_s5 = int_to_ptr.vmem [resolvable:$true] %s858_s5 }
 0x24f   :  { %v553_v37 = vpop.f32.mrf.mxu2 }
 0x250   :  { %v554_v38 = vadd.f32 %v1446_v45, %v553_v37 }
 0x252   :  { %v571_v40 = vmax.f32 %v554_v38, 0.0 }
 0x254   :  { %v579_v44 = vpack.c.bf16 %v571_v40, %v570_v39 }
 0x256   :  { %691 = vmatmul.bf16.gmra.mxu3 %v579_v44 }
 0x269   :  { %v657_v46 = vpop.f32.mrf.mxu3 }
 0x26a   :  { %v658_v48 = vadd.f32 %v1114_v47, %v657_v46 }
 0x26c   :  { %v697_v49 = vmax.f32 %v658_v48, 0.0 }
 0x271   :  { %v659_v41 = vpop.f32.mrf.mxu3 }
 0x272   :  { %v660_v43 = vadd.f32 %v1114_v47, %v659_v41 }
 0x274   :  { %v698_v50 = vmax.f32 %v660_v43, 0.0 }
 0x276   :  { %v713_v51 = vpack.c.bf16 %v698_v50, %v697_v49 }
 0x278   :  { %797 = vmatmul.bf16.vlgmr.msrb.gmra.mxu0 %v713_v51 }
 0x279   :  { %v662_v45 = vpop.f32.mrf.mxu3 }
 0x27a   :  { %v663_v52 = vadd.f32 %v1114_v47, %v662_v45 }
 0x27c   :  { %v699_v55 = vmax.f32 %v663_v52, 0.0 }
 0x281   :  { %v664_v53 = vpop.f32.mrf.mxu3 }
 0x282   :  { %v665_v54 = vadd.f32 %v1114_v47, %v664_v53 }
 0x284   :  { %v700_v56 = vmax.f32 %v665_v54, 0.0 }
 0x286   :  { %v714_v57 = vpack.c.bf16 %v700_v56, %v699_v55 }
 0x288   :  { %802 = vmatmul.bf16.gmra.mxu0 %v714_v57 }
 0x289   :  { %v667_v58 = vpop.f32.mrf.mxu3 }
 0x28a   :  { %v668_v59 = vadd.f32 %v1114_v47, %v667_v58 }
 0x28c   :  { %v701_v62 = vmax.f32 %v668_v59, 0.0 }
 0x291   :  { %v669_v60 = vpop.f32.mrf.mxu3 }
 0x292   :  { %v670_v61 = vadd.f32 %v1114_v47, %v669_v60 }
 0x294   :  { %v702_v63 = vmax.f32 %v670_v61, 0.0 }
 0x296   :  { %v715_v0 = vpack.c.bf16 %v702_v63, %v701_v62 }
 0x298   :  { %807 = vmatmul.bf16.gmra.mxu0 %v715_v0 }
 0x299   :  { %v672_v1 = vpop.f32.mrf.mxu3 }
 0x29a   :  { %v673_v2 = vadd.f32 %v1114_v47, %v672_v1 }
 0x29c   :  { %v703_v5 = vmax.f32 %v673_v2, 0.0 }
 0x2a1   :  { %v674_v3 = vpop.f32.mrf.mxu3 }
 0x2a2   :  { %v675_v4 = vadd.f32 %v1114_v47, %v674_v3 }
 0x2a4   :  { %v704_v6 = vmax.f32 %v675_v4, 0.0 }
 0x2a6   :  { %v716_v7 = vpack.c.bf16 %v704_v6, %v703_v5 }
 0x2a8   :  { %812 = vmatmul.bf16.gmra.mxu0 %v716_v7 }
 0x2a9   :  { %v677_v8 = vpop.f32.mrf.mxu3 }
 0x2aa   :  { %v678_v9 = vadd.f32 %v1114_v47, %v677_v8 }
 0x2ac   :  { %v705_v12 = vmax.f32 %v678_v9, 0.0 }
 0x2b1   :  { %v679_v10 = vpop.f32.mrf.mxu3 }
 0x2b2   :  { %v680_v11 = vadd.f32 %v1114_v47, %v679_v10 }
 0x2b4   :  { %v706_v13 = vmax.f32 %v680_v11, 0.0 }
 0x2b6   :  { %v717_v14 = vpack.c.bf16 %v706_v13, %v705_v12 }
 0x2b8   :  { %817 = vmatmul.bf16.gmra.mxu0 %v717_v14 }
 0x2b9   :  { %v682_v15 = vpop.f32.mrf.mxu3 }
 0x2ba   :  { %v683_v16 = vadd.f32 %v1114_v47, %v682_v15 }
 0x2bc   :  { %v707_v19 = vmax.f32 %v683_v16, 0.0 }
 0x2c1   :  { %v684_v17 = vpop.f32.mrf.mxu3 }
 0x2c2   :  { %v685_v18 = vadd.f32 %v1114_v47, %v684_v17 }
 0x2c4   :  { %v708_v20 = vmax.f32 %v685_v18, 0.0 }
 0x2c6   :  { %v718_v21 = vpack.c.bf16 %v708_v20, %v707_v19 }
 0x2c8   :  { %822 = vmatmul.bf16.gmra.mxu0 %v718_v21 }
 0x2c9   :  { %v687_v22 = vpop.f32.mrf.mxu3 }
 0x2ca   :  { %v688_v23 = vadd.f32 %v1114_v47, %v687_v22 }
 0x2cc   :  { %v709_v26 = vmax.f32 %v688_v23, 0.0 }
 0x2d1   :  { %v689_v24 = vpop.f32.mrf.mxu3 }
 0x2d2   :  { %v690_v25 = vadd.f32 %v1114_v47, %v689_v24 }
 0x2d4   :  { %v710_v27 = vmax.f32 %v690_v25, 0.0 }
 0x2d6   :  { %v719_v28 = vpack.c.bf16 %v710_v27, %v709_v26 }
 0x2d8   :  { %827 = vmatmul.bf16.gmra.mxu0 %v719_v28 }
 0x2d9   :  { %v692_v29 = vpop.f32.mrf.mxu3 }
 0x2da   :  { %v693_v30 = vadd.f32 %v1114_v47, %v692_v29 }
 0x2dc   :  { %v711_v33 = vmax.f32 %v693_v30, 0.0 }
 0x2e1   :  { %v694_v31 = vpop.f32.mrf.mxu3 }
 0x2e2   :  { %v695_v32 = vadd.f32 %v1114_v47, %v694_v31 }
 0x2e4   :  { %v712_v34 = vmax.f32 %v695_v32, 0.0 }
 0x2e6   :  { %v720_v35 = vpack.c.bf16 %v712_v34, %v711_v33 }
 0x2e8   :  { %832 = vmatmul.bf16.gmra.mxu0 %v720_v35 }
 0x2f5   :  { %v798_v37 = vpop.f32.mrf.mxu0 }
 0x2f6   :  { %v799_v38 = vadd.f32 %v1115_v36, %v798_v37 }
 0x2f8   :  { %838 = vst [vmem:[#allocation13] sm:$0xff] %v799_v38 }
 0x2fd   :  { %v800_v39 = vpop.f32.mrf.mxu0 }
 0x2fe   :  { %v801_v40 = vadd.f32 %v1115_v36, %v800_v39 }
 0x300   :  { %839 = vst [vmem:[#allocation13 + $0x8] sm:$0xff] %v801_v40 }
 0x305   :  { %v803_v42 = vpop.f32.mrf.mxu0 }
 0x306   :  { %v804_v44 = vadd.f32 %v1115_v36, %v803_v42 }
 0x308   :  { %840 = vst [vmem:[#allocation13 + $0x10] sm:$0xff] %v804_v44 }
 0x30d   :  { %v805_v46 = vpop.f32.mrf.mxu0 }
 0x30e   :  { %v806_v48 = vadd.f32 %v1115_v36, %v805_v46 }
 0x310   :  { %841 = vst [vmem:[#allocation13 + $0x18] sm:$0xff] %v806_v48 }
 0x315   :  { %v808_v47 = vpop.f32.mrf.mxu0 }
 0x316   :  { %v809_v41 = vadd.f32 %v1115_v36, %v808_v47 }
 0x318   :  { %842 = vst [vmem:[#allocation13 + $0x20] sm:$0xff] %v809_v41 }
 0x31d   :  { %v810_v43 = vpop.f32.mrf.mxu0 }
 0x31e   :  { %v811_v49 = vadd.f32 %v1115_v36, %v810_v43 }
 0x320   :  { %843 = vst [vmem:[#allocation13 + $0x28] sm:$0xff] %v811_v49 }
 0x325   :  { %v813_v50 = vpop.f32.mrf.mxu0 }
 0x326   :  { %v814_v51 = vadd.f32 %v1115_v36, %v813_v50 }
 0x328   :  { %844 = vst [vmem:[#allocation13 + $0x30] sm:$0xff] %v814_v51 }
 0x32d   :  { %v815_v45 = vpop.f32.mrf.mxu0 }
 0x32e   :  { %v816_v52 = vadd.f32 %v1115_v36, %v815_v45 }
 0x330   :  { %845 = vst [vmem:[#allocation13 + $0x38] sm:$0xff] %v816_v52 }
 0x335   :  { %v818_v53 = vpop.f32.mrf.mxu0 }
 0x336   :  { %v819_v54 = vadd.f32 %v1115_v36, %v818_v53 }
 0x338   :  { %846 = vst [vmem:[#allocation13 + $0x40] sm:$0xff] %v819_v54 }
 0x33d   :  { %v820_v55 = vpop.f32.mrf.mxu0 }
 0x33e   :  { %v821_v56 = vadd.f32 %v1115_v36, %v820_v55 }
 0x340   :  { %847 = vst [vmem:[#allocation13 + $0x48] sm:$0xff] %v821_v56 }
 0x345   :  { %v823_v57 = vpop.f32.mrf.mxu0 }
 0x346   :  { %v824_v58 = vadd.f32 %v1115_v36, %v823_v57 }
 0x348   :  { %848 = vst [vmem:[#allocation13 + $0x50] sm:$0xff] %v824_v58 }
 0x34d   :  { %v825_v59 = vpop.f32.mrf.mxu0 }
 0x34e   :  { %v826_v60 = vadd.f32 %v1115_v36, %v825_v59 }
 0x350   :  { %849 = vst [vmem:[#allocation13 + $0x58] sm:$0xff] %v826_v60 }
 0x355   :  { %v828_v61 = vpop.f32.mrf.mxu0 }
 0x356   :  { %v829_v62 = vadd.f32 %v1115_v36, %v828_v61 }
 0x358   :  { %850 = vst [vmem:[#allocation13 + $0x60] sm:$0xff] %v829_v62 }
 0x35d   :  { %v830_v63 = vpop.f32.mrf.mxu0 }
 0x35e   :  { %v831_v0 = vadd.f32 %v1115_v36, %v830_v63 }
 0x360   :  { %851 = vst [vmem:[#allocation13 + $0x68] sm:$0xff] %v831_v0 }
 0x365   :  { %v833_v1 = vpop.f32.mrf.mxu0 }
 0x366   :  { %v834_v2 = vadd.f32 %v1115_v36, %v833_v1 }
 0x368   :  { %852 = vst [vmem:[#allocation13 + $0x70] sm:$0xff] %v834_v2 }
 0x36d   :  { %v835_v3 = vpop.f32.mrf.mxu0 }
 0x36e   :  { %v836_v4 = vadd.f32 %v1115_v36, %v835_v3 }
 0x370   :  { %853 = vst [vmem:[#allocation13 + $0x78] sm:$0xff] %v836_v4 }
 0x371   :  { %866 = dma.vmem_to_hbm [thread:$0]  %s859_s5, 2048, %s861_s14, [#allocation4], %s1299_s16, %s1299_s16, %s1300_s17  }
 0x372   :  { %1292 = dma.done.wait [#allocation4], 2048  }
 0x373   :  { %1293 = vsyncadd [#allocation4], 4294965248 }
 0x374   :  { %871 = vsyncpa [#allocation3], 1 }
 0x375   :  { %872 = vsyncpa [#allocation6], 1 }
 0x376   :  { %873 = vsyncpa [#allocation9], 1 }
 0x377   :  { %874 = vsyncpa [#allocation12], 1 }
 0x378   :  { %875 = vsyncpa [#allocation4], 1 }

</bundles_post_ra>
